<compile_context>
chip_gen: v7x
topology: tpu7x:2x2x1
jax: 0.10.0
libtpu: 0.0.40
codegen_flags: <defaults>
</compile_context>

<pallas_src>
import math

import jax
import jax.numpy as jnp
from jax import lax
from jax.experimental import pallas as pl
from jax.experimental.pallas import tpu as pltpu


def attention_kernel(x_ref, wq_ref, bq_ref, wk_ref, bk_ref, wv_ref, bv_ref,
                     wo_ref, bo_ref, out_ref, probs_ref, probs2_ref):
    """One grid step = one (batch, head) pair.

    x_ref:      (1, S, H)   bf16 activations
    wq/k/v_ref: (1, H, hd)  bf16 per-head projection weights (wq pre-scaled)
    bq/k/v_ref: (1, 1, hd)  f32 per-head biases (bq pre-scaled)
    wo_ref:     (1, hd, H)  bf16 per-head slice of the output projection
    bo_ref:     (1, H)      f32 output bias
    out_ref:    (1, S, H)   f32, accumulated across the head grid axis
    probs_ref:  (1, 1, S, S) softmax over last axis (attention weights)
    probs2_ref: (1, 1, S, S) softmax over axis -2 (the module's softmax2)
    """
    h = pl.program_id(1)

    x = x_ref[0]                                              # (S, H) bf16

    # Per-head projections (bf16 MXU matmuls, f32 accumulate + f32 bias).
    q = jnp.dot(x, wq_ref[0], preferred_element_type=jnp.float32) + bq_ref[0]
    k = jnp.dot(x, wk_ref[0], preferred_element_type=jnp.float32) + bk_ref[0]
    v = jnp.dot(x, wv_ref[0], preferred_element_type=jnp.float32) + bv_ref[0]

    # scores = q @ k^T — contract the last dim of both operands so no
    # transpose is materialized. Scale is already folded into wq/bq.
    scores = lax.dot_general(
        q.astype(x.dtype), k.astype(x.dtype),
        dimension_numbers=(((1,), (1,)), ((), ())),
        preferred_element_type=jnp.float32)                   # (S, S)

    # One exp shared by both softmaxes: subtracting the single global max of
    # the tile is valid for a softmax along either axis.
    m = jnp.max(jnp.max(scores, axis=-1, keepdims=True), axis=-2, keepdims=True)
    e = jnp.exp(scores - m)
    p1 = e * pl.reciprocal(jnp.sum(e, axis=-1, keepdims=True), approx=False)
    p2 = e * pl.reciprocal(jnp.sum(e, axis=-2, keepdims=True), approx=False)

    probs_ref[0, 0] = p1.astype(probs_ref.dtype)
    probs2_ref[0, 0] = p2.astype(probs2_ref.dtype)

    # Per-head context and its contribution to the output projection.
    ctx = jnp.dot(p1.astype(x.dtype), v.astype(x.dtype),
                  preferred_element_type=jnp.float32)         # (S, hd)
    part = jnp.dot(ctx.astype(x.dtype), wo_ref[0],
                   preferred_element_type=jnp.float32)        # (S, H)

    # Accumulate the output projection across heads in the resident f32 block.
    @pl.when(h == 0)
    def _init():
        out_ref[0] = (part + bo_ref[...]).astype(out_ref.dtype)

    @pl.when(h != 0)
    def _accum():
        out_ref[0] = (out_ref[0] + part).astype(out_ref.dtype)


def attention_forward(x, params, *, num_heads, probs_dtype=jnp.float32):
    """x: (B, S, H) float32. Returns (out, weights, softmax2_scores)."""
    B, S, H = x.shape
    assert H % num_heads == 0
    head_dim = H // num_heads
    scale = 1.0 / math.sqrt(head_dim)
    cdt = jnp.bfloat16  # MXU operand dtype

    # Trace-time (XLA-side) weight re-layout: split heads, fold the score
    # scale into the query projection, cast matmul operands to bf16.
    def split_w(w):                                   # (H, H) -> (nh, H, hd)
        return w.reshape(H, num_heads, head_dim).transpose(1, 0, 2)

    def split_b(b):                                   # (1, H) -> (nh, 1, hd)
        return b.reshape(num_heads, 1, head_dim)

    wq = split_w(params["wq"] * scale).astype(cdt)
    bq = (split_b(params["bq"]) * scale).astype(jnp.float32)
    wk = split_w(params["wk"]).astype(cdt)
    bk = split_b(params["bk"]).astype(jnp.float32)
    wv = split_w(params["wv"]).astype(cdt)
    bv = split_b(params["bv"]).astype(jnp.float32)
    wo = params["wo"].reshape(num_heads, head_dim, H).astype(cdt)
    bo = params["bo"].astype(jnp.float32)
    xc = x.astype(cdt)

    w_spec = pl.BlockSpec((1, H, head_dim), lambda b, h: (h, 0, 0))
    b_spec = pl.BlockSpec((1, 1, head_dim), lambda b, h: (h, 0, 0))

    out_shapes = (
        jax.ShapeDtypeStruct((B, S, H), jnp.float32),            # attention_output
        jax.ShapeDtypeStruct((B, num_heads, S, S), probs_dtype),  # weights (softmax -1)
        jax.ShapeDtypeStruct((B, num_heads, S, S), probs_dtype),  # softmax2 (softmax -2)
    )

    return pl.pallas_call(
        attention_kernel,
        out_shape=out_shapes,
        grid_spec=pltpu.PrefetchScalarGridSpec(
            num_scalar_prefetch=0,
            grid=(B, num_heads),
            in_specs=[
                pl.BlockSpec((1, S, H), lambda b, h: (b, 0, 0)),   # x
                w_spec, b_spec,                                    # query (pre-scaled)
                w_spec, b_spec,                                    # key
                w_spec, b_spec,                                    # value
                pl.BlockSpec((1, head_dim, H), lambda b, h: (h, 0, 0)),  # out weight
                pl.BlockSpec((1, H), lambda b, h: (0, 0)),               # out bias
            ],
            out_specs=[
                pl.BlockSpec((1, S, H), lambda b, h: (b, 0, 0)),         # accum over h
                pl.BlockSpec((1, 1, S, S), lambda b, h: (b, h, 0, 0)),
                pl.BlockSpec((1, 1, S, S), lambda b, h: (b, h, 0, 0)),
            ],
        ),
        compiler_params=pltpu.CompilerParams(
            dimension_semantics=("parallel", "arbitrary"),
            vmem_limit_bytes=32 * 1024 * 1024,
        ),
    )(xc, wq, bq, wk, bk, wv, bv, wo, bo)


def init_params(key, hidden_size):
    """Deterministic synthetic weights. W is [H_in, H_out], bias [1, H_out]."""
    keys = jax.random.split(key, 8)
    scale = 1.0 / math.sqrt(hidden_size)
    def w(k):
        return jax.random.normal(k, (hidden_size, hidden_size), jnp.float32) * scale
    def b(k):
        return jax.random.normal(k, (1, hidden_size), jnp.float32) * 0.01
    return {
        "wq": w(keys[0]), "bq": b(keys[1]),
        "wk": w(keys[2]), "bk": b(keys[3]),
        "wv": w(keys[4]), "bv": b(keys[5]),
        "wo": w(keys[6]), "bo": b(keys[7]),
    }


def reference_forward(x, params, *, num_heads):
    """Pure-JAX reference mirroring the kernel's bf16-operand / f32-accumulate
    matmuls (softmax in f32), so tolerances can stay tight."""
    B, S, H = x.shape
    hd = H // num_heads
    scale = 1.0 / math.sqrt(hd)
    c, f = jnp.bfloat16, jnp.float32
    xb = x.astype(c)

    def lin(w, b, s=1.0):
        wb = (w * s).astype(c)
        return jnp.einsum("bsk,kh->bsh", xb, wb, preferred_element_type=f) + b[0] * s

    q = lin(params["wq"], params["bq"], scale)
    k = lin(params["wk"], params["bk"])
    v = lin(params["wv"], params["bv"])

    def split(t):
        return t.reshape(B, S, num_heads, hd).transpose(0, 2, 1, 3)

    qh, kh, vh = split(q), split(k), split(v)
    scores = jnp.einsum("bhqd,bhkd->bhqk", qh.astype(c), kh.astype(c),
                        preferred_element_type=f)
    probs = jax.nn.softmax(scores, axis=-1)
    probs2 = jax.nn.softmax(scores, axis=-2)
    ctx = jnp.einsum("bhqk,bhkd->bhqd", probs.astype(c), vh.astype(c),
                     preferred_element_type=f)
    ctx = ctx.transpose(0, 2, 1, 3).reshape(B, S, H)
    out = jnp.einsum("bsd,dh->bsh", ctx.astype(c), params["wo"].astype(c),
                     preferred_element_type=f) + params["bo"][0]
    return out, probs, probs2


if __name__ == "__main__":
    # Small shapes consistent with the module: hidden=32, heads=4, seq=8, batch=2.
    B, S, H, NH = 2, 8, 32, 4

    key = jax.random.PRNGKey(0)
    k_x, k_p = jax.random.split(key)
    x = jax.random.normal(k_x, (B, S, H), jnp.float32)
    params = init_params(k_p, H)

    out, weights, probs2 = attention_forward(x, params, num_heads=NH)
    jax.block_until_ready((out, weights, probs2))

    # Correctness: compare against a bf16-matmul / f32-softmax reference.
    ref_out, ref_w, ref_p2 = reference_forward(x, params, num_heads=NH)
    assert out.shape == (B, S, H)
    assert weights.shape == (B, NH, S, S) and probs2.shape == (B, NH, S, S)
    assert jnp.allclose(out, ref_out, atol=2e-3, rtol=2e-3)
    assert jnp.allclose(weights, ref_w, atol=2e-3, rtol=2e-3)
    assert jnp.allclose(probs2, ref_p2, atol=2e-3, rtol=2e-3)
    # Exact softmax structure checks (independent of matmul precision).
    assert jnp.allclose(weights.sum(axis=-1), 1.0, atol=1e-5)
    assert jnp.allclose(probs2.sum(axis=-2), 1.0, atol=1e-5)

    print("KERNEL_OK")
</pallas_src>

<mosaic_0001>
module attributes {stable_mosaic.version = 11 : i64} {
  func.func @attention_kernel(%arg0: i32, %arg1: i32, %arg2: memref<1x8x32xbf16, #tpu.memory_space<vmem>>, %arg3: memref<1x32x8xbf16, #tpu.memory_space<vmem>>, %arg4: memref<1x1x8xf32, #tpu.memory_space<vmem>>, %arg5: memref<1x32x8xbf16, #tpu.memory_space<vmem>>, %arg6: memref<1x1x8xf32, #tpu.memory_space<vmem>>, %arg7: memref<1x32x8xbf16, #tpu.memory_space<vmem>>, %arg8: memref<1x1x8xf32, #tpu.memory_space<vmem>>, %arg9: memref<1x8x32xbf16, #tpu.memory_space<vmem>>, %arg10: memref<1x32xf32, #tpu.memory_space<vmem>>, %arg11: memref<1x8x32xf32, #tpu.memory_space<vmem>>, %arg12: memref<1x1x8x8xf32, #tpu.memory_space<vmem>>, %arg13: memref<1x1x8x8xf32, #tpu.memory_space<vmem>>) attributes {dimension_semantics = [#tpu.dimension_semantics<parallel>, #tpu.dimension_semantics<arbitrary>], iteration_bounds = array<i64: 2, 4>, scalar_prefetch = 0 : i64, scratch_operands = 0 : i64, tpu.core_type = #tpu.core_type<tc>, window_params = [{transform_indices = @transform_0, window_bounds = array<i64: 1, 8, 32>}, {transform_indices = @transform_1, window_bounds = array<i64: 1, 32, 8>}, {transform_indices = @transform_2, window_bounds = array<i64: 1, 1, 8>}, {transform_indices = @transform_3, window_bounds = array<i64: 1, 32, 8>}, {transform_indices = @transform_4, window_bounds = array<i64: 1, 1, 8>}, {transform_indices = @transform_5, window_bounds = array<i64: 1, 32, 8>}, {transform_indices = @transform_6, window_bounds = array<i64: 1, 1, 8>}, {transform_indices = @transform_7, window_bounds = array<i64: 1, 8, 32>}, {pipeline_mode = #tpu.pipeline_mode<synchronous>, transform_indices = @transform_8, window_bounds = array<i64: 1, 32>}, {transform_indices = @transform_9, window_bounds = array<i64: 1, 8, 32>}, {transform_indices = @transform_10, window_bounds = array<i64: 1, 1, 8, 8>}, {transform_indices = @transform_11, window_bounds = array<i64: 1, 1, 8, 8>}]} {
    %c0 = arith.constant 0 : index
    %c0_0 = arith.constant 0 : index
    %c0_1 = arith.constant 0 : index
    %0 = vector.load %arg2[%c0, %c0_0, %c0_1] : memref<1x8x32xbf16, #tpu.memory_space<vmem>>, vector<1x8x32xbf16>
    %1 = vector.shape_cast %0 : vector<1x8x32xbf16> to vector<8x32xbf16>
    %c0_2 = arith.constant 0 : index
    %c0_3 = arith.constant 0 : index
    %c0_4 = arith.constant 0 : index
    %2 = vector.load %arg3[%c0_2, %c0_3, %c0_4] : memref<1x32x8xbf16, #tpu.memory_space<vmem>>, vector<1x32x8xbf16>
    %3 = vector.shape_cast %2 : vector<1x32x8xbf16> to vector<32x8xbf16>
    %cst = arith.constant dense<0.000000e+00> : vector<8x8xf32>
    %4 = tpu.matmul %1, %3, %cst {dimension_numbers = #tpu.dot_dimension_numbers<[1], [0], [0], [1], [0, 0, 1, 1], [], []>} : vector<8x32xbf16>, vector<32x8xbf16>, vector<8x8xf32> -> vector<8x8xf32>
    %c0_5 = arith.constant 0 : index
    %c0_6 = arith.constant 0 : index
    %c0_7 = arith.constant 0 : index
    %5 = vector.load %arg4[%c0_5, %c0_6, %c0_7] : memref<1x1x8xf32, #tpu.memory_space<vmem>>, vector<1x1x8xf32>
    %6 = vector.shape_cast %5 : vector<1x1x8xf32> to vector<1x8xf32>
    %7 = vector.broadcast %6 : vector<1x8xf32> to vector<8x8xf32>
    %8 = arith.addf %4, %7 : vector<8x8xf32>
    %c0_8 = arith.constant 0 : index
    %c0_9 = arith.constant 0 : index
    %c0_10 = arith.constant 0 : index
    %9 = vector.load %arg5[%c0_8, %c0_9, %c0_10] : memref<1x32x8xbf16, #tpu.memory_space<vmem>>, vector<1x32x8xbf16>
    %10 = vector.shape_cast %9 : vector<1x32x8xbf16> to vector<32x8xbf16>
    %cst_11 = arith.constant dense<0.000000e+00> : vector<8x8xf32>
    %11 = tpu.matmul %1, %10, %cst_11 {dimension_numbers = #tpu.dot_dimension_numbers<[1], [0], [0], [1], [0, 0, 1, 1], [], []>} : vector<8x32xbf16>, vector<32x8xbf16>, vector<8x8xf32> -> vector<8x8xf32>
    %c0_12 = arith.constant 0 : index
    %c0_13 = arith.constant 0 : index
    %c0_14 = arith.constant 0 : index
    %12 = vector.load %arg6[%c0_12, %c0_13, %c0_14] : memref<1x1x8xf32, #tpu.memory_space<vmem>>, vector<1x1x8xf32>
    %13 = vector.shape_cast %12 : vector<1x1x8xf32> to vector<1x8xf32>
    %14 = vector.broadcast %13 : vector<1x8xf32> to vector<8x8xf32>
    %15 = arith.addf %11, %14 : vector<8x8xf32>
    %c0_15 = arith.constant 0 : index
    %c0_16 = arith.constant 0 : index
    %c0_17 = arith.constant 0 : index
    %16 = vector.load %arg7[%c0_15, %c0_16, %c0_17] : memref<1x32x8xbf16, #tpu.memory_space<vmem>>, vector<1x32x8xbf16>
    %17 = vector.shape_cast %16 : vector<1x32x8xbf16> to vector<32x8xbf16>
    %cst_18 = arith.constant dense<0.000000e+00> : vector<8x8xf32>
    %18 = tpu.matmul %1, %17, %cst_18 {dimension_numbers = #tpu.dot_dimension_numbers<[1], [0], [0], [1], [0, 0, 1, 1], [], []>} : vector<8x32xbf16>, vector<32x8xbf16>, vector<8x8xf32> -> vector<8x8xf32>
    %c0_19 = arith.constant 0 : index
    %c0_20 = arith.constant 0 : index
    %c0_21 = arith.constant 0 : index
    %19 = vector.load %arg8[%c0_19, %c0_20, %c0_21] : memref<1x1x8xf32, #tpu.memory_space<vmem>>, vector<1x1x8xf32>
    %20 = vector.shape_cast %19 : vector<1x1x8xf32> to vector<1x8xf32>
    %21 = vector.broadcast %20 : vector<1x8xf32> to vector<8x8xf32>
    %22 = arith.addf %18, %21 : vector<8x8xf32>
    %23 = arith.truncf %8 : vector<8x8xf32> to vector<8x8xbf16>
    %24 = arith.truncf %15 : vector<8x8xf32> to vector<8x8xbf16>
    %cst_22 = arith.constant dense<0.000000e+00> : vector<8x8xf32>
    %25 = tpu.matmul %23, %24, %cst_22 {dimension_numbers = #tpu.dot_dimension_numbers<[1], [1], [0], [0], [0, 0, 1, 0], [], []>} : vector<8x8xbf16>, vector<8x8xbf16>, vector<8x8xf32> -> vector<8x8xf32>
    %cst_23 = arith.constant dense<0xFF800000> : vector<8xf32>
    %26 = vector.multi_reduction <maximumf>, %25, %cst_23 [1] : vector<8x8xf32> to vector<8xf32>
    %27 = vector.shape_cast %26 : vector<8xf32> to vector<8x1xf32>
    %cst_24 = arith.constant dense<0xFF800000> : vector<1xf32>
    %28 = vector.multi_reduction <maximumf>, %27, %cst_24 [0] : vector<8x1xf32> to vector<1xf32>
    %29 = vector.shape_cast %28 : vector<1xf32> to vector<1x1xf32>
    %30 = vector.broadcast %29 : vector<1x1xf32> to vector<8x8xf32>
    %31 = arith.subf %25, %30 : vector<8x8xf32>
    %32 = math.exp %31 : vector<8x8xf32>
    %cst_25 = arith.constant dense<0.000000e+00> : vector<8xf32>
    %33 = vector.multi_reduction <add>, %32, %cst_25 [1] : vector<8x8xf32> to vector<8xf32>
    %34 = vector.shape_cast %33 : vector<8xf32> to vector<8x1xf32>
    %35 = tpu.reciprocal %34 : vector<8x1xf32> -> vector<8x1xf32>
    %36 = vector.broadcast %35 : vector<8x1xf32> to vector<8x8xf32>
    %37 = arith.mulf %32, %36 : vector<8x8xf32>
    %cst_26 = arith.constant dense<0.000000e+00> : vector<8xf32>
    %38 = vector.multi_reduction <add>, %32, %cst_26 [0] : vector<8x8xf32> to vector<8xf32>
    %39 = vector.shape_cast %38 : vector<8xf32> to vector<1x8xf32>
    %40 = tpu.reciprocal %39 : vector<1x8xf32> -> vector<1x8xf32>
    %41 = vector.broadcast %40 : vector<1x8xf32> to vector<8x8xf32>
    %42 = arith.mulf %32, %41 : vector<8x8xf32>
    %c0_27 = arith.constant 0 : index
    %c0_28 = arith.constant 0 : index
    %c0_29 = arith.constant 0 : index
    %c0_30 = arith.constant 0 : index
    %43 = vector.load %arg12[%c0_27, %c0_28, %c0_29, %c0_30] : memref<1x1x8x8xf32, #tpu.memory_space<vmem>>, vector<1x1x8x8xf32>
    %44 = vector.shape_cast %43 : vector<1x1x8x8xf32> to vector<8x8xf32>
    %45 = vector.shape_cast %37 : vector<8x8xf32> to vector<1x1x8x8xf32>
    tpu.vector_store %arg12[%c0_27, %c0_28, %c0_29, %c0_30], %45 {strides = array<i32>} : memref<1x1x8x8xf32, #tpu.memory_space<vmem>>, vector<1x1x8x8xf32>,
    %c0_31 = arith.constant 0 : index
    %c0_32 = arith.constant 0 : index
    %c0_33 = arith.constant 0 : index
    %c0_34 = arith.constant 0 : index
    %46 = vector.load %arg13[%c0_31, %c0_32, %c0_33, %c0_34] : memref<1x1x8x8xf32, #tpu.memory_space<vmem>>, vector<1x1x8x8xf32>
    %47 = vector.shape_cast %46 : vector<1x1x8x8xf32> to vector<8x8xf32>
    %48 = vector.shape_cast %42 : vector<8x8xf32> to vector<1x1x8x8xf32>
    tpu.vector_store %arg13[%c0_31, %c0_32, %c0_33, %c0_34], %48 {strides = array<i32>} : memref<1x1x8x8xf32, #tpu.memory_space<vmem>>, vector<1x1x8x8xf32>,
    %49 = arith.truncf %37 : vector<8x8xf32> to vector<8x8xbf16>
    %50 = arith.truncf %22 : vector<8x8xf32> to vector<8x8xbf16>
    %cst_35 = arith.constant dense<0.000000e+00> : vector<8x8xf32>
    %51 = tpu.matmul %49, %50, %cst_35 {dimension_numbers = #tpu.dot_dimension_numbers<[1], [0], [0], [1], [0, 0, 1, 1], [], []>} : vector<8x8xbf16>, vector<8x8xbf16>, vector<8x8xf32> -> vector<8x8xf32>
    %52 = arith.truncf %51 : vector<8x8xf32> to vector<8x8xbf16>
    %c0_36 = arith.constant 0 : index
    %c0_37 = arith.constant 0 : index
    %c0_38 = arith.constant 0 : index
    %53 = vector.load %arg9[%c0_36, %c0_37, %c0_38] : memref<1x8x32xbf16, #tpu.memory_space<vmem>>, vector<1x8x32xbf16>
    %54 = vector.shape_cast %53 : vector<1x8x32xbf16> to vector<8x32xbf16>
    %cst_39 = arith.constant dense<0.000000e+00> : vector<8x32xf32>
    %55 = tpu.matmul %52, %54, %cst_39 {dimension_numbers = #tpu.dot_dimension_numbers<[1], [0], [0], [1], [0, 0, 1, 1], [], []>} : vector<8x8xbf16>, vector<8x32xbf16>, vector<8x32xf32> -> vector<8x32xf32>
    %c0_i32 = arith.constant 0 : i32
    %56 = arith.cmpi eq, %arg1, %c0_i32 : i32
    %57 = arith.extui %56 : i1 to i32
    %c0_i32_40 = arith.constant 0 : i32
    %58 = arith.cmpi ne, %57, %c0_i32_40 : i32
    scf.if %58 {
      %c0_43 = arith.constant 0 : index
      %c0_44 = arith.constant 0 : index
      %62 = vector.load %arg10[%c0_43, %c0_44] : memref<1x32xf32, #tpu.memory_space<vmem>>, vector<1x32xf32>
      %63 = vector.broadcast %62 : vector<1x32xf32> to vector<8x32xf32>
      %64 = arith.addf %55, %63 : vector<8x32xf32>
      %c0_45 = arith.constant 0 : index
      %c0_46 = arith.constant 0 : index
      %c0_47 = arith.constant 0 : index
      %65 = vector.load %arg11[%c0_45, %c0_46, %c0_47] : memref<1x8x32xf32, #tpu.memory_space<vmem>>, vector<1x8x32xf32>
      %66 = vector.shape_cast %65 : vector<1x8x32xf32> to vector<8x32xf32>
      %67 = vector.shape_cast %64 : vector<8x32xf32> to vector<1x8x32xf32>
      tpu.vector_store %arg11[%c0_45, %c0_46, %c0_47], %67 {strides = array<i32>} : memref<1x8x32xf32, #tpu.memory_space<vmem>>, vector<1x8x32xf32>,
    } else {
    }
    %c0_i32_41 = arith.constant 0 : i32
    %59 = arith.cmpi ne, %arg1, %c0_i32_41 : i32
    %60 = arith.extui %59 : i1 to i32
    %c0_i32_42 = arith.constant 0 : i32
    %61 = arith.cmpi ne, %60, %c0_i32_42 : i32
    scf.if %61 {
      %c0_43 = arith.constant 0 : index
      %c0_44 = arith.constant 0 : index
      %c0_45 = arith.constant 0 : index
      %62 = vector.load %arg11[%c0_43, %c0_44, %c0_45] : memref<1x8x32xf32, #tpu.memory_space<vmem>>, vector<1x8x32xf32>
      %63 = vector.shape_cast %62 : vector<1x8x32xf32> to vector<8x32xf32>
      %64 = arith.addf %63, %55 : vector<8x32xf32>
      %c0_46 = arith.constant 0 : index
      %c0_47 = arith.constant 0 : index
      %c0_48 = arith.constant 0 : index
      %65 = vector.load %arg11[%c0_46, %c0_47, %c0_48] : memref<1x8x32xf32, #tpu.memory_space<vmem>>, vector<1x8x32xf32>
      %66 = vector.shape_cast %65 : vector<1x8x32xf32> to vector<8x32xf32>
      %67 = vector.shape_cast %64 : vector<8x32xf32> to vector<1x8x32xf32>
      tpu.vector_store %arg11[%c0_46, %c0_47, %c0_48], %67 {strides = array<i32>} : memref<1x8x32xf32, #tpu.memory_space<vmem>>, vector<1x8x32xf32>,
    } else {
    }
    return
  }
  func.func @transform_0(%arg0: i32, %arg1: i32) -> (i32, i32, i32) {
    %c0_i32 = arith.constant 0 : i32
    %c0_i32_0 = arith.constant 0 : i32
    %c0_i32_1 = arith.constant 0 : i32
    return %arg0, %c0_i32, %c0_i32_0 : i32, i32, i32
  }
  func.func @transform_1(%arg0: i32, %arg1: i32) -> (i32, i32, i32) {
    %c0_i32 = arith.constant 0 : i32
    %c0_i32_0 = arith.constant 0 : i32
    %c0_i32_1 = arith.constant 0 : i32
    return %arg1, %c0_i32, %c0_i32_0 : i32, i32, i32
  }
  func.func @transform_2(%arg0: i32, %arg1: i32) -> (i32, i32, i32) {
    %c0_i32 = arith.constant 0 : i32
    %c0_i32_0 = arith.constant 0 : i32
    %c0_i32_1 = arith.constant 0 : i32
    return %arg1, %c0_i32, %c0_i32_0 : i32, i32, i32
  }
  func.func @transform_3(%arg0: i32, %arg1: i32) -> (i32, i32, i32) {
    %c0_i32 = arith.constant 0 : i32
    %c0_i32_0 = arith.constant 0 : i32
    %c0_i32_1 = arith.constant 0 : i32
    return %arg1, %c0_i32, %c0_i32_0 : i32, i32, i32
  }
  func.func @transform_4(%arg0: i32, %arg1: i32) -> (i32, i32, i32) {
    %c0_i32 = arith.constant 0 : i32
    %c0_i32_0 = arith.constant 0 : i32
    %c0_i32_1 = arith.constant 0 : i32
    return %arg1, %c0_i32, %c0_i32_0 : i32, i32, i32
  }
  func.func @transform_5(%arg0: i32, %arg1: i32) -> (i32, i32, i32) {
    %c0_i32 = arith.constant 0 : i32
    %c0_i32_0 = arith.constant 0 : i32
    %c0_i32_1 = arith.constant 0 : i32
    return %arg1, %c0_i32, %c0_i32_0 : i32, i32, i32
  }
  func.func @transform_6(%arg0: i32, %arg1: i32) -> (i32, i32, i32) {
    %c0_i32 = arith.constant 0 : i32
    %c0_i32_0 = arith.constant 0 : i32
    %c0_i32_1 = arith.constant 0 : i32
    return %arg1, %c0_i32, %c0_i32_0 : i32, i32, i32
  }
  func.func @transform_7(%arg0: i32, %arg1: i32) -> (i32, i32, i32) {
    %c0_i32 = arith.constant 0 : i32
    %c0_i32_0 = arith.constant 0 : i32
    %c0_i32_1 = arith.constant 0 : i32
    return %arg1, %c0_i32, %c0_i32_0 : i32, i32, i32
  }
  func.func @transform_8(%arg0: i32, %arg1: i32) -> (i32, i32) {
    %c0_i32 = arith.constant 0 : i32
    %c0_i32_0 = arith.constant 0 : i32
    %c0_i32_1 = arith.constant 0 : i32
    return %c0_i32, %c0_i32_0 : i32, i32
  }
  func.func @transform_9(%arg0: i32, %arg1: i32) -> (i32, i32, i32) {
    %c0_i32 = arith.constant 0 : i32
    %c0_i32_0 = arith.constant 0 : i32
    %c0_i32_1 = arith.constant 0 : i32
    return %arg0, %c0_i32, %c0_i32_0 : i32, i32, i32
  }
  func.func @transform_10(%arg0: i32, %arg1: i32) -> (i32, i32, i32, i32) {
    %c0_i32 = arith.constant 0 : i32
    %c0_i32_0 = arith.constant 0 : i32
    %c0_i32_1 = arith.constant 0 : i32
    return %arg0, %arg1, %c0_i32, %c0_i32_0 : i32, i32, i32, i32
  }
  func.func @transform_11(%arg0: i32, %arg1: i32) -> (i32, i32, i32, i32) {
    %c0_i32 = arith.constant 0 : i32
    %c0_i32_0 = arith.constant 0 : i32
    %c0_i32_1 = arith.constant 0 : i32
    return %arg0, %arg1, %c0_i32, %c0_i32_0 : i32, i32, i32, i32
  }
}

</mosaic_0001>

<bundles_post_ra>
// kernel: tpu_custom_call.1
= control target key start
LH: loop header
LB: loop body
LE: loop exit
PB: predicated region body
PF: predicated region fallthrough
CT: control target
= control target key end

     0   :  { %s2014_s0 = inlined_call_operand.vmem [shape: bf16[2,8,32], index: 0, kind: input, shape index: {}]   ;;  %s2015_s1 = inlined_call_operand.vmem [shape: bf16[4,32,8], index: 1, kind: input, shape index: {}]   ;;  %s2016_s2 = inlined_call_operand.vmem [shape: f32[4,1,8], index: 2, kind: input, shape index: {}]   ;;  %s2017_s3 = inlined_call_operand.vmem [shape: bf16[4,32,8], index: 3, kind: input, shape index: {}]   ;;  %s2018_s4 = inlined_call_operand.vmem [shape: f32[4,1,8], index: 4, kind: input, shape index: {}]   ;;  %s2019_s5 = inlined_call_operand.vmem [shape: bf16[4,32,8], index: 5, kind: input, shape index: {}]   ;;  %s2020_s6 = inlined_call_operand.vmem [shape: f32[4,1,8], index: 6, kind: input, shape index: {}]   ;;  %s2021_s7 = inlined_call_operand.vmem [shape: bf16[4,8,32], index: 7, kind: input, shape index: {}]   ;;  %s2022_s8 = inlined_call_operand.vmem [shape: f32[1,32], index: 8, kind: input, shape index: {}]   ;;  %s2023_s9 = inlined_call_operand.hbm [shape: f32[2,8,32], index: 9, kind: output, shape index: {0}]   ;;  %s2024_s10 = inlined_call_operand.hbm [shape: f32[2,4,8,8], index: 10, kind: output, shape index: {1}]   ;;  %s2025_s11 = inlined_call_operand.hbm [shape: f32[2,4,8,8], index: 11, kind: output, shape index: {2}]  }
   0x1   :  { %2043 = sst [smem:[#allocation19_spill]] %s2014_s0 }
   0x2   :  { %2044 = sst [smem:[#allocation20_spill]] %s2015_s1 }
   0x3   :  { %2045 = sst [smem:[#allocation21_spill]] %s2016_s2 }
   0x4   :  { %2046 = sst [smem:[#allocation22_spill]] %s2017_s3 }
   0x5   :  { %2047 = sst [smem:[#allocation23_spill]] %s2018_s4 }
   0x6   :  { %2048 = sst [smem:[#allocation24_spill]] %s2019_s5 }
   0x7   :  { %2049 = sst [smem:[#allocation25_spill]] %s2023_s9 }
   0x8   :  { %2050 = sst [smem:[#allocation26_spill]] %s2024_s10 }
   0x9   :  { %2051 = sst [smem:[#allocation27_spill]] %s2025_s11 }
   0xa   :  { %17 = vsyncpa [#allocation3], 0 }
   0xb   :  { %19 = vsyncpa [#allocation3 + $0x1], 0 }
   0xc   :  { %20 = vsyncpa [#allocation5], 0 }
   0xd   :  { %22 = vsyncpa [#allocation5 + $0x1], 0  ;;  %s1655_s17 = smov 0   ;;  %s1657_s18 = smov 0  }
   0xe   :  { %s1659_s19 = smov 0   ;;  %s1661_s20 = smov 0  }
   0xf   :  { %s1663_s21 = smov 0   ;;  %s1665_s22 = smov 0  }
  0x10   :  { %s1667_s23 = smov 0   ;;  %s1669_s24 = smov 0  }
  0x11   :  { %s1671_s25 = smov 0   ;;  %s1673_s26 = smov 0  }
  0x12   :  { %s1675_s27 = smov 0  }
  0x13 LB: > { %2052 = sst [smem:[#allocation9_spill]] %s1556_s19  ;;  %s2026_s28 = sadd.s32 4294967295, %s1588_s27   ;;  %s1588_s27 = sphi %s1675_s27, %s28_s27   ;;  %s1584_s26 = sphi %s1673_s26, %s2091_s26   ;;  %s1580_s25 = sphi %s1671_s25, %s2090_s25   ;;  %s1576_s24 = sphi %s1669_s24, %s2089_s24   ;;  %s1572_s23 = sphi %s1667_s23, %s2088_s23   ;;  %s1568_s22 = sphi %s1665_s22, %s2087_s22   ;;  %s1564_s21 = sphi %s1663_s21, %s2095_s21   ;;  %s1560_s20 = sphi %s1661_s20, %s2094_s20   ;;  %s1556_s19 = sphi %s1659_s19, %s2085_s19   ;;  %s1552_s18 = sphi %s1657_s18, %s2093_s18   ;;  %s1548_s17 = sphi %s1655_s17, %s2092_s17  }
  0x14   : > { %2053 = sst [smem:[#allocation10_spill]] %s1560_s20  ;;  %s2030_s29 = sadd.s32 4294967294, %s1588_s27  }
  0x15   : > { %2054 = sst [smem:[#allocation11_spill]] %s1568_s22  ;;  %s37_s30 = sadd.s32 1, %s1580_s25 }
  0x16   : > { %2055 = sst [smem:[#allocation12_spill]] %s1580_s25  ;;  %s40_s12 = sadd.s32 1, %s1584_s26 }
  0x17   : > { %2056 = sst [smem:[#allocation13_spill]] %s1584_s26  ;;  %p38_p0 = scmp.ge.s32.totalorder %s37_s30, 4 }
  0x18   : > { %s276_s13 = sadd.s32 1, %s1568_s22  ;;  %p286_p1 = scmp.ne.s32.totalorder %s1568_s22, %s1564_s21 }
  0x19   : > { %p1719_p2 = scmp.eq.s32.totalorder %s2026_s28, 7  ;;  %s2097_s30 = smov (%p38_p0, %s37_s30), 0 }
  0x1a   : > { %2058 = sst [smem:[#allocation14_spill]] %s2097_s30  ;;  %s2099_s12 = smov (!%p38_p0, %s40_s12), %s1584_s26 }
  0x1b   : > { %p1728_p3 = por %p1719_p2, %p286_p1  ;;  %p292_p4 = scmp.ne.s32.totalorder %s1564_s21, %s1560_s20 }
  0x1c   : > { %p42_p5 = scmp.ge.s32.totalorder %s2099_s12, 2  ;;  %p1736_p6 = scmp.eq.s32.totalorder %s2030_s29, 7 }
  0x1d   : > { %s2059_s15 = scalar_select %p1728_p3, 1, 0 }
  0x1e   : > { %s300_s28 = ssub.s32 %s1580_s25, %s2097_s30  ;;  %s304_s11 = sadd.s32 1, %s1556_s19 }
  0x1f   : > { %2060 = sst [smem:[#allocation15_spill]] %s2059_s15  ;;  %s2101_s12 = smov (%p42_p5, %s2099_s12), 0 }
  0x20   : > { %2062 = sst [smem:[#allocation16_spill]] %s2101_s12  ;;  %p1747_p7 = por %p1736_p6, %p292_p4 }
  0x21   : > { %p314_p8 = scmp.ne.s32.totalorder %s1556_s19, %s1552_s18  ;;  %s273_s20 = ssub.s32 %s1584_s26, %s2101_s12 }
  0x22   : > { %p320_p9 = scmp.ne.s32.totalorder %s1552_s18, %s1548_s17  ;;  %p274_p10 = scmp.eq.s32.totalorder %s273_s20, 0 }
  0x23   : > { %s301_s29 = sor.u32 %s300_s28, %s273_s20  ;;  %p1759_p12 = por %p314_p8, %p1719_p2 }
  0x24   : > { %p302_p11 = scmp.eq.s32.totalorder %s301_s29, 0  ;;  %p1771_p13 = por %p320_p9, %p1736_p6 }
  0x25   : > { %s1764_s30 = scalar_select %p274_p10, %s1568_s22, %s276_s13  }
  0x26   : > { %s1767_s25 = scalar_select %p302_p11, %s1556_s19, %s304_s11  }
  0x27   : > { %2065 = sst [smem:[#allocation17_spill]] %s1764_s30  ;;  %p1191_p0 = scmp.ge.s32.totalorder %s1588_s27, 1 }
  0x28   : > { %2066 = sst [smem:[#allocation18_spill]] %s1767_s25  ;;  %p426_p1 = scmp.lt.s32.totalorder %s1588_s27, 9 }
  0x2a   : > { %p427_p4 = pnand %p1191_p0, %p426_p1 }
  0x2b   : > { %p507_p2 = scmp.lt.s32.totalorder (!%p427_p4), %s1572_s23, 3  ;;  %s2036_s17 = sand.u32 (!%p427_p4), 1, %s1564_s21   ;;  %v1590_v0 = vmov (!%p427_p4), 0.0   ;;  %vm1591_vm0 = vmmov (!%p427_p4), 0   ;;  %vm560_vm1 = vcmask (!%p427_p4), 261120   ;;  %vm732_vm2 = vcmask (!%p427_p4), 64512  }
  0x2c   : > { %430 = sbr.rel (%p427_p4) target bundleno = 1345 (0x541), region = 56  ;;  %1257 = vmatprep.subr.bf16.mxu1 (!%p427_p4), %v1590_v0  ;;  %s1782_s11 = sshll.u32 (!%p427_p4), %s2036_s17, 3  ;;  %1249 = vmatprep.subr.bf16.mxu0 (!%p427_p4), %v1590_v0  ;;  %vm811_vm3 = vcmask (!%p427_p4), 1043456  }
  0x2d   : > { %1261 = vmatprep.mubr.msk.bf16.mxu1 (!%p427_p4), %vm1591_vm0, %v1590_v0  ;;  %1253 = vmatprep.mubr.msk.bf16.mxu0 (!%p427_p4), %vm1591_vm0, %v1590_v0  ;;  %p503_p5 = scmp.lt.s32.totalorder (!%p427_p4), %s1576_s24, 1  ;;  %s2068_s3 = sld [smem:[#allocation22_spill]] (!%p427_p4) }
  0x2e   : > { %s2069_s1 = sld [smem:[#allocation20_spill]] (!%p427_p4)  ;;  %s2070_s5 = sld [smem:[#allocation24_spill]] (!%p427_p4) }
  0x2f   : > { %s2071_s0 = sld [smem:[#allocation19_spill]] (!%p427_p4)  ;;  %s2072_s4 = sld [smem:[#allocation23_spill]] (!%p427_p4) }
  0x30   : > { %s2073_s2 = sld [smem:[#allocation21_spill]] (!%p427_p4)  ;;  %p1218_p6 = scmp.ne.s32.totalorder (!%p427_p4), %s1572_s23, 0 }
  0x33   : > { %s1786_s20 = scalar_select %p507_p2, %s1572_s23, 3 }
  0x34   : > { %s504_s26 = scalar_select %p503_p5, %s1576_s24, 1 }
  0x35   : > { %s1231_s28 = sshll.u32 %s1786_s20, 4  ;;  %s530_s13 = scalar_lea.vmem %s2020_s6, %s1786_s20 }
  0x36   : > { %s519_s14 = scalar_lea.vmem %s2068_s3, %s1231_s28  ;;  %s511_s12 = scalar_lea.vmem %s2069_s1, %s1231_s28  ;;  %v1211_v48 = vld [vmem:[%s530_s13] ss:$0 sm:$0xff] }
  0x37   : > { %v1398_v1 = vld [vmem:[%s519_s14] sm:$0xff]   ;;  %v1399_v2 = vld [vmem:[%s519_s14 + $0x8] sm:$0xff]   ;;  %s1804_s25 = scalar_lea.vmem %s2070_s5, %s1231_s28  ;;  %s1195_s19 = sshll.u32 %s504_s26, 2 }
  0x38   : > { %1258 = vmatpush3.bf16.msra.mxu1 %v1398_v1  ;;  %v1400_v3 = vld [vmem:[%s511_s12] sm:$0xff]   ;;  %v1401_v4 = vld [vmem:[%s511_s12 + $0x8] sm:$0xff]   ;;  %s506_s17 = scalar_lea.vmem %s2071_s0, %s1195_s19  ;;  %s522_s26 = scalar_lea.vmem %s2072_s4, %s1786_s20 }
  0x39   : > { %1259 = vmatprep.subr.bf16.mxu1 %v1590_v0  ;;  %1250 = vmatpush3.bf16.msra.mxu0 %v1400_v3  ;;  %v536_v5 = vld [vmem:[%s506_s17] sm:$0xf]  ;;  %s514_s28 = scalar_lea.vmem %s2073_s2, %s1786_s20  ;;  %v1403_v22 = vld [vmem:[%s1804_s25 + $0x8] sm:$0xff]   ;;  %s1202_s19 = sshll.u32 %s1786_s20, 2 }
  0x3a   : > { %1251 = vmatprep.subr.bf16.mxu0 %v1590_v0  ;;  %v1207_v6 = vld [vmem:[%s522_s26] ss:$0 sm:$0xff]  ;;  %s534_s30 = scalar_lea.vmem %s2021_s7, %s1202_s19  ;;  %s1863_s20 = scalar_lea.vmem [#allocation2], %s1782_s11 }
  0x3b   : > { %v1203_v11 = vld [vmem:[%s514_s28] ss:$0 sm:$0xff] }
  0x3c   : > { %1260 = vmatpush3.bf16.msra.mxu1 %v1399_v2  ;;  %v1402_v21 = vld [vmem:[%s1804_s25] sm:$0xff]   ;;  %s493_s25 = sand.u32 1, %s1552_s18  }
  0x3d   : > { %1273 = vmatprep.subr.bf16.mxu1 %v1590_v0  ;;  %1252 = vmatpush3.bf16.msra.mxu0 %v1401_v4  ;;  %s1842_s14 = sshll.u32 %s493_s25, 3  ;;  %v856_v55 = vld [vmem:[%s534_s30] sm:$0xf] }
  0x3e   : > { %1265 = vmatprep.subr.bf16.mxu0 %v1590_v0  ;;  %s2041_s17 = scalar_lea.vmem [#allocation6], %s1842_s14  ;;  %v861_v56 = vsel %vm811_vm3, %v856_v55, 0  ;;  %s495_s12 = scalar_lea.vmem [#allocation4], %s1842_s14 }
  0x3f   : > { %1262 = vmatmul.mubr.msk.bf16.vlgmr.msra.gmra.mrb[0].mxu1 %vm560_vm1, %v536_v5 }
  0x40   : > { %1275 = vmatprep.mubr.msk.bf16.mxu1 %vm1591_vm0, %v1590_v0  ;;  %1254 = vmatmul.mubr.msk.bf16.vlgmr.msra.gmra.mrb[0].mxu0 %vm560_vm1, %v536_v5 }
  0x41   : > { %1269 = vmatprep.mubr.msk.bf16.mxu0 %vm1591_vm0, %v1590_v0  ;;  %1266 = vmatpush3.bf16.msra.mxu0 %v1402_v21 }
  0x42   : > { %1267 = vmatprep.subr.bf16.mxu0 %v1590_v0 }
  0x45   : > { %1268 = vmatpush3.bf16.msra.mxu0 %v1403_v22 }
  0x46   : > { %1279 = vmatprep.subr.bf16.mxu0 %v1590_v0 }
  0x48   : > { %1270 = vmatmul.mubr.msk.bf16.vlgmr.msra.gmra.mrb[4].mxu0 %vm560_vm1, %v536_v5 }
  0x49   : > { %1281 = vmatprep.mubr.msk.bf16.mxu0 %vm1591_vm0, %v1590_v0 }
 0x112   : > { %v661_v7 = vpop.f32.mrb[0].mxu1 }
 0x113   : > { %v662_v8 = vadd.f32 %v1207_v6, %v661_v7  ;;  %v1263_v9 = vpop.f32.mrb[1].mxu1  ;;  %v598_v12 = vpop.f32.mrb[0].mxu0  ;;  %v1219_v6 = vld [vmem:[%s2022_s8] ss:$0 sm:$0xff] (!%p1218_p6) }
 0x114   : > { %v664_v10 = vpop.f32.mrb[2].mxu1  ;;  %v1255_v15 = vpop.f32.mrb[1].mxu0  ;;  %v599_v18 = vadd.f32 %v1203_v11, %v598_v12 }
 0x115   : > { %v731_v13 = vpack.c.bf16 %v662_v8, %v662_v8  ;;  %v1264_v14 = vpop.f32.mrb[3].mxu1  ;;  %v601_v16 = vpop.f32.mrb[2].mxu0 }
 0x116   : > { %v1256_v19 = vpop.f32.mrb[3].mxu0  ;;  %v730_v20 = vpack.c.bf16 %v599_v18, %v599_v18 }
 0x117   : > { %v737_v17 = vsel %vm732_vm2, %v731_v13, 0 }
 0x118   : > { %1274 = vmatpush3.bf16.xpose.msra.mxu1 %v737_v17 }
 0x119   : > { %1285 = vmatprep.subr.bf16.mxu1 %v1590_v0 }
 0x11b   : > { %v724_v45 = vpop.f32.mrb[4].mxu0 }
 0x11c   : > { %v1271_v46 = vpop.f32.mrb[5].mxu0  ;;  %v725_v50 = vadd.f32 %v1211_v48, %v724_v45 }
 0x11d   : > { %v727_v47 = vpop.f32.mrb[6].mxu0 }
 0x11e   : > { %v1272_v49 = vpop.f32.mrb[7].mxu0  ;;  %v807_v53 = vpack.c.bf16 %v725_v50, %v725_v50 }
 0x11f   : > { %1276 = vmatmul.mubr.msk.bf16.vlgmr.msra.gmra.mrb[4].mxu1 %vm732_vm2, %v730_v20 }
 0x120   : > { %1287 = vmatprep.mubr.msk.bf16.mxu1 %vm1591_vm0, %v1590_v0  ;;  %v813_v54 = vsel %vm811_vm3, %v807_v53, 0  ;;  %1286 = vmatpush3.bf16.msra.mxu1 %v861_v56 }
 0x121   : > { %1280 = vmatpush3.bf16.msra.mxu0 %v813_v54 }
 0x1f2   : > { %v773_v23 = vpop.f32.mrb[4].mxu1 }
 0x1f3   : > { %v1277_v24 = vpop.f32.mrb[5].mxu1  ;;  %v779_v25 = vsel %vm732_vm2, %v773_v23, -inf }
 0x1f4   : > { %780 = vmax.xlane.f32.xlu0 %v779_v25  ;;  %v776_v26 = vpop.f32.mrb[6].mxu1 }
 0x1f5   : > { %v1278_v27 = vpop.f32.mrb[7].mxu1 }
 0x281   : > { %v781_v28 = vpop.xlane.xlu0 %780 }
 0x282   : > { %v782_v29 = vrot.slane %v781_v28, 4 }
 0x284   : > { %v783_v30 = vmax.f32 %v781_v28, %v782_v29 }
 0x286   : > { %v784_v31 = vrot.slane %v783_v30, 2 }
 0x288   : > { %v785_v32 = vmax.f32 %v783_v30, %v784_v31 }
 0x28a   : > { %v786_v33 = vrot.slane %v785_v32, 1 }
 0x28c   : > { %v787_v34 = vmax.f32 %v785_v32, %v786_v33 }
 0x28e   : > { %v788_v35 = vsub.f32 %v773_v23, %v787_v34 }
 0x290   : > { %v789_v36 = vmul.f32 1.442695, %v788_v35 }
 0x292   : > { %1404 = vpow2.f32 %v789_v36 }
 0x29c   : > { %v1405_v37 = vpop.eup %1404 }
 0x29d   : > { %v791_v38 = vsel %vm732_vm2, %v1405_v37, 0.0 }
 0x29e   : > { %792 = vadd.xlane.f32.xlu0 %v791_v38  ;;  %v796_v39 = vrot.slane %v791_v38, 4 }
 0x2a0   : > { %v797_v40 = vadd.f32 %v796_v39, %v791_v38 }
 0x2a2   : > { %v798_v41 = vrot.slane %v797_v40, 2 }
 0x2a4   : > { %v799_v42 = vadd.f32 %v798_v41, %v797_v40 }
 0x2a6   : > { %v800_v43 = vrot.slane %v799_v42, 1 }
 0x2a8   : > { %v801_v44 = vadd.f32 %v800_v43, %v799_v42 }
 0x2aa   : > { %1406 = vrcp.f32 %v801_v44 }
 0x2b4   : > { %v1407_v51 = vpop.eup %1406 }
 0x2b5   : > { %v803_v52 = vmul.f32 %v1407_v51, %v1405_v37 }
 0x2b7   : > { %805 = vst.msk [vmem:[%s2041_s17] sm:$0xff] %vm732_vm2, %v803_v52 }
 0x32b   : > { %v793_v57 = vpop.xlane.xlu0 %792 }
 0x32c   : > { %1408 = vrcp.f32 %v793_v57 }
 0x336   : > { %v1409_v58 = vpop.eup %1408 }
 0x337   : > { %v795_v59 = vmul.f32 %v1409_v58, %v1405_v37 }
 0x339   : > { %804 = vst.msk [vmem:[%s495_s12] sm:$0xff] %vm732_vm2, %v795_v59  ;;  %v806_v60 = vpack.c.bf16 %v795_v59, %v795_v59 }
 0x33b   : > { %1282 = vmatmul.mubr.msk.bf16.vlgmr.msra.gmra.mrb[8].mxu0 %vm732_vm2, %v806_v60 }
 0x40e   : > { %v849_v61 = vpop.f32.mrb[8].mxu0 }
 0x40f   : > { %v855_v62 = vpack.c.bf16 %v849_v61, %v849_v61  ;;  %v1283_v63 = vpop.f32.mrb[9].mxu0 }
 0x410   : > { %v852_v0 = vpop.f32.mrb[10].mxu0 }
 0x411   : > { %v1284_v1 = vpop.f32.mrb[11].mxu0  ;;  %1288 = vmatmul.mubr.msk.bf16.vlgmr.msra.gmra.mrb[8].mxu1 %vm732_vm2, %v855_v62 }
 0x4e1   : > { %906 = sbr.rel (%p1218_p6) target bundleno = 1256 (0x4e8), region = 60 }
 0x4e4   : > { %v897_v2 = vpop.f32.mrb[8].mxu1 }
 0x4e5   : > { %v1289_v3 = vpop.f32.mrb[9].mxu1  ;;  %v914_v7 = vadd.f32 (!%p1218_p6), %v1219_v6, %v897_v2 }
 0x4e6   : > { %v900_v4 = vpop.f32.mrb[10].mxu1 }
 0x4e7   : > { %v1290_v5 = vpop.f32.mrb[11].mxu1  ;;  %915 = vst.msk [vmem:[%s1863_s20] sm:$0xff] (!%p1218_p6), %vm560_vm1, %v914_v7 }
 0x4e8 PF: > { %p1220_p8 = scmp.eq.s32.totalorder %s1572_s23, 0 }
 0x4ea   : > { %919 = sbr.rel (%p1220_p8) target bundleno = 1266 (0x4f2), region = 64 }
 0x4ee   : > { %v920_v8 = vld [vmem:[%s1863_s20] sm:$0xff] (!%p1220_p8) }
 0x4ef   : > { %v921_v9 = vadd.f32 (!%p1220_p8), %v920_v8, %v897_v2 }
 0x4f1   : > { %922 = vst.msk [vmem:[%s1863_s20] sm:$0xff] %vm560_vm1, %v921_v9 }
 0x4f2 PF: > { %s2074_s11 = sadd.s32 4294967295, %s1588_s27   ;;  %s1225_s29 = sshll.u32 %s1576_s24, 2 }
 0x4f3   : > { %s1877_s16 = sand.u32 1, %s2074_s11   ;;  %s1881_s13 = sadd.s32 %s1572_s23, %s1225_s29 }
 0x4f4   : > { %s2042_s19 = sshll.u32 %s1881_s13, 7  ;;  %s962_s22 = sshll.u32 %s495_s12, 4  ;;  %s963_s22 = int_to_ptr.vmem [resolvable:$true] %s962_s22 }
 0x4f5   : > { %s2075_s28 = sld [smem:[#allocation26_spill]]  ;;  %s929_s17 = scalar_lea.sflag [#allocation5], %s1877_s16 }
 0x4f6   : > { %s1410_s0 = scalar_lea.vmem %s963_s22, 128  ;;  %s1592_s23 = smov [#allocation4]  }
 0x4f7   : > { %p1411_p9 = scmp.ne.s32.totalorder %s963_s22, %s1410_s0  ;;  %s1414_s11 = sshll.u32 %s1592_s23, 4  ;;  %s1415_s11 = int_to_ptr.vmem [resolvable:$false] %s1414_s11 }
 0x4f8   : > { %s1416_s29 = scalar_lea.vmem %s1415_s11, 256  ;;  %p1417_p0 = scmp.lt.s32.totalorder %s963_s22, %s1415_s11 }
 0x4f9   : > { %p1412_p10 = pnand %p1411_p9, %p1759_p12  ;;  %p1418_p1 = scmp.lt.s32.totalorder %s1416_s29, %s1410_s0 }
 0x4fb   : > { %s1891_s25 = scalar_lea.hbm %s2075_s28, %s2042_s19  ;;  %p1413_p11 = pneg %p1412_p10 }
 0x4fc   : > { %p1419_p4 = por %p1418_p1, %p1417_p0 }
 0x4fe   : > { %p1420_p2 = pnand %p1419_p4, %p1413_p11 }
 0x500   : > { %1423 = shalt.err (!%p1420_p2)
}
 0x501   : > { %s1424_s12 = scalar_lea.hbm %s1891_s25, 128  ;;  %s1428_s23 = scalar_lea.hbm %s2075_s28, 1024 }
 0x502   : > { %p1425_p5 = scmp.ne.s32.totalorder %s1891_s25, %s1424_s12  ;;  %p1429_p9 = scmp.lt.u32.totalorder %s1891_s25, %s2075_s28 }
 0x503   : > { %p1430_p10 = scmp.lt.u32.totalorder %s1428_s23, %s1424_s12  ;;  %p1432_p0 = scmp.lt.u32.totalorder %s1424_s12, %s1891_s25 }
 0x504   : > { %p1426_p6 = pnand %p1425_p5, %p1759_p12 }
 0x505   : > { %p1431_p11 = por %p1430_p10, %p1429_p9 }
 0x506   : > { %p1427_p8 = pneg %p1426_p6 }
 0x507   : > { %p1433_p1 = por %p1432_p0, %p1431_p11 }
 0x509   : > { %p1434_p4 = pnand %p1433_p1, %p1427_p8 }
 0x50b   : > { %1437 = shalt.err (!%p1434_p4)
}
 0x50c   : > { %1292 = dma.vmem_to_hbm [thread:$0]  (%p1759_p12), %s963_s22, 128, %s1891_s25, %s929_s17  }
 0x50d   : > { %s1224_s29 = sshll.u32 %s1576_s24, 7  ;;  %s2077_s30 = sld [smem:[#allocation25_spill]] }
 0x50e   : > { %s947_s12 = sshll.u32 %s1863_s20, 4  ;;  %s2078_s11 = sshll.u32 %s1881_s13, 7  ;;  %s1920_s12 = int_to_ptr.vmem [resolvable:$true] %s947_s12 }
 0x50f   : > { %s2079_s3 = sld [smem:[#allocation27_spill]]  ;;  %s2080_s5 = sand.u32 1, %s1564_s21  }
 0x510   : > { %s924_s22 = scalar_lea.sflag [#allocation3], %s2080_s5  ;;  %s1438_s24 = scalar_lea.vmem %s1920_s12, 128 }
 0x511   : > { %p1439_p2 = scmp.ne.s32.totalorder %s1920_s12, %s1438_s24  ;;  %s1593_s25 = smov [#allocation2]  }
 0x512   : > { %s1442_s20 = sshll.u32 %s1593_s25, 4  ;;  %s1443_s20 = int_to_ptr.vmem [resolvable:$false] %s1442_s20 }
 0x513   : > { %s1917_s23 = scalar_lea.hbm %s2077_s30, %s1224_s29  ;;  %p1440_p5 = pnand %p1439_p2, %p1728_p3 }
 0x514   : > { %s1444_s29 = scalar_lea.vmem %s1443_s20, 256  ;;  %p1445_p8 = scmp.lt.s32.totalorder %s1920_s12, %s1443_s20 }
 0x515   : > { %s1927_s4 = scalar_lea.hbm %s2079_s3, %s2078_s11  ;;  %p1441_p6 = pneg %p1440_p5 }
 0x516   : > { %p1446_p9 = scmp.lt.s32.totalorder %s1444_s29, %s1438_s24 }
 0x518   : > { %p1447_p10 = por %p1446_p9, %p1445_p8 }
 0x51a   : > { %p1448_p11 = pnand %p1447_p10, %p1441_p6 }
 0x51c   : > { %1451 = shalt.err (!%p1448_p11)
}
 0x51d   : > { %s1452_s1 = scalar_lea.hbm %s1917_s23, 128  ;;  %s1456_s13 = scalar_lea.hbm %s2077_s30, 256 }
 0x51e   : > { %p1453_p0 = scmp.ne.s32.totalorder %s1917_s23, %s1452_s1  ;;  %p1457_p2 = scmp.lt.u32.totalorder %s1917_s23, %s2077_s30 }
 0x51f   : > { %p1458_p5 = scmp.lt.u32.totalorder %s1456_s13, %s1452_s1  ;;  %p1460_p8 = scmp.lt.u32.totalorder %s1452_s1, %s1917_s23 }
 0x520   : > { %p1454_p1 = pnand %p1453_p0, %p1728_p3 }
 0x521   : > { %p1459_p6 = por %p1458_p5, %p1457_p2 }
 0x522   : > { %p1455_p4 = pneg %p1454_p1 }
 0x523   : > { %p1461_p9 = por %p1460_p8, %p1459_p6 }
 0x525   : > { %p1462_p10 = pnand %p1461_p9, %p1455_p4 }
 0x527   : > { %1465 = shalt.err (!%p1462_p10)
}
 0x528   : > { %1291 = dma.vmem_to_hbm [thread:$0]  (%p1728_p3), %s1920_s12, 128, %s1917_s23, %s924_s22  }
 0x529   : > { %s2081_s11 = scalar_lea.vmem [#allocation6], %s1842_s14  ;;  %s1594_s20 = smov [#allocation6]  }
 0x52a   : > { %s977_s24 = sshll.u32 %s2081_s11, 4  ;;  %s1470_s29 = sshll.u32 %s1594_s20, 4  ;;  %s978_s24 = int_to_ptr.vmem [resolvable:$true] %s977_s24  ;;  %s1471_s29 = int_to_ptr.vmem [resolvable:$false] %s1470_s29 }
 0x52b   : > { %s1466_s25 = scalar_lea.vmem %s978_s24, 128  ;;  %s1472_s1 = scalar_lea.vmem %s1471_s29, 256 }
 0x52c   : > { %p1467_p11 = scmp.ne.s32.totalorder %s978_s24, %s1466_s25  ;;  %p1473_p4 = scmp.lt.s32.totalorder %s978_s24, %s1471_s29 }
 0x52d   : > { %p1474_p2 = scmp.lt.s32.totalorder %s1472_s1, %s1466_s25 }
 0x52e   : > { %p1468_p0 = pnand %p1467_p11, %p1759_p12 }
 0x52f   : > { %p1475_p5 = por %p1474_p2, %p1473_p4 }
 0x530   : > { %p1469_p1 = pneg %p1468_p0 }
 0x532   : > { %p1476_p6 = pnand %p1475_p5, %p1469_p1 }
 0x534   : > { %1479 = shalt.err (!%p1476_p6)
}
 0x535   : > { %s1480_s14 = scalar_lea.hbm %s1927_s4, 128  ;;  %s1484_s12 = scalar_lea.hbm %s2079_s3, 1024 }
 0x536   : > { %p1481_p3 = scmp.ne.s32.totalorder %s1927_s4, %s1480_s14  ;;  %p1485_p10 = scmp.lt.u32.totalorder %s1927_s4, %s2079_s3 }
 0x537   : > { %p1486_p11 = scmp.lt.u32.totalorder %s1484_s12, %s1480_s14  ;;  %p1488_p1 = scmp.lt.u32.totalorder %s1480_s14, %s1927_s4 }
 0x538   : > { %p1482_p8 = pnand %p1481_p3, %p1759_p12 }
 0x539   : > { %p1487_p0 = por %p1486_p11, %p1485_p10 }
 0x53a   : > { %p1483_p9 = pneg %p1482_p8 }
 0x53b   : > { %p1489_p4 = por %p1488_p1, %p1487_p0 }
 0x53d   : > { %p1490_p2 = pnand %p1489_p4, %p1483_p9 }
 0x53f   : > { %1493 = shalt.err (!%p1490_p2)
}
 0x540   : > { %1293 = dma.vmem_to_hbm [thread:$0]  (%p1759_p12), %s978_s24, 128, %s1927_s4, %s929_s17  }
 0x541 PF: > { %s2082_s5 = sld [smem:[#allocation10_spill]]  ;;  %p1307_p5 = scmp.ge.s32.totalorder %s1588_s27, 2 }
 0x543   : > { %p1298_p6 = pnand %p1307_p5, %p1747_p7 }
 0x547   : > { %s989_s13 = sand.u32 1, %s2082_s5  }
 0x548   : > { %s990_s19 = scalar_lea.sflag [#allocation3], %s989_s13 }
 0x549   : > { %1539 = dma.done.wait (!%p1298_p6), %s990_s19, 128  }
 0x54a   : > { %1541 = vsyncadd (!%p1298_p6), %s990_s19, 4294967168  ;;  %s2083_s26 = sadd.s32 4294967294, %s1588_s27   ;;  %p1301_p3 = pnand %p1307_p5, %p1771_p13 }
 0x54b   : > { %s998_s11 = sand.u32 1, %s2083_s26  }
 0x54c   : > { %s999_s15 = scalar_lea.sflag [#allocation5], %s998_s11 }
 0x54d   : > { %1543 = dma.done.wait (!%p1301_p3), %s999_s15, 256  }
 0x54e   : > { %1545 = vsyncadd (!%p1301_p3), %s999_s15, 4294967040  ;;  %s28_s27 = sadd.s32 1, %s1588_s27   ;;  %s2084_s4 = sld [smem:[#allocation9_spill]] }
 0x54f   : > { %p25_p12 = scmp.ge.s32.totalorder %s28_s27, 10   ;;  %s2085_s19 = sld [smem:[#allocation18_spill]] }
 0x550   : > { %s2086_s9 = sld [smem:[#allocation11_spill]]  ;;  %s2087_s22 = sld [smem:[#allocation17_spill]] }
 0x551   : > { %s2088_s23 = sld [smem:[#allocation12_spill]]  ;;  %s2089_s24 = sld [smem:[#allocation13_spill]] }
 0x552   : > { %s2090_s25 = sld [smem:[#allocation14_spill]]  ;;  %s2091_s26 = sld [smem:[#allocation16_spill]] }
 0x553   : > { %s2092_s17 = smov %s1552_s18  ;;  %s2094_s20 = smov %s1564_s21 }
 0x554   : > { %s2093_s18 = smov %s2084_s4  ;;  %27 = sbr.rel (!%p25_p12) target bundleno = 19 (0x13), region = 152 }
 0x556   : > { %s2095_s21 = smov %s2086_s9 }
 0x55b   :  { %1013 = vsyncpa [#allocation3], 1 }
 0x55c   :  { %1015 = vsyncpa [#allocation3 + $0x1], 1 }
 0x55d   :  { %1016 = vsyncpa [#allocation5], 1 }
 0x55e   :  { %1018 = vsyncpa [#allocation5 + $0x1], 1 }

</bundles_post_ra>
